<compile_context>
chip_gen: v6e
topology: v6e:2x2x1
jax: 0.10.0
libtpu: 0.0.40
codegen_flags: <defaults>
</compile_context>

<pallas_src>
import jax
import jax.numpy as jnp
from jax.experimental import pallas as pl
from jax.experimental.pallas import tpu as pltpu


# ---------------------------------------------------------------------------
# Kernels
# ---------------------------------------------------------------------------
def _train_kernel(x_ref, w_ref, b_ref, eps_ref, out_ref):
    # One fused MXU pass: (TILE_N, C) @ (C, 2L) -> (TILE_N, 2L), f32 accumulate.
    y = jnp.dot(x_ref[...], w_ref[...], preferred_element_type=jnp.float32)
    y = y + b_ref[...]                               # bias broadcast over rows
    L = out_ref.shape[-1]
    mu = y[:, :L]                                    # static lane slices
    logvar = y[:, L:]
    sigma = jnp.exp(0.5 * logvar)                    # EUP exp, f32 epilogue
    out_ref[...] = (mu + sigma * eps_ref[...]).astype(out_ref.dtype)


def _eval_kernel(x_ref, w_ref, b_ref, out_ref):
    mu = jnp.dot(x_ref[...], w_ref[...], preferred_element_type=jnp.float32)
    out_ref[...] = (mu + b_ref[...]).astype(out_ref.dtype)


# ---------------------------------------------------------------------------
# Parameter prep (hoisted out of the per-call forward)
# ---------------------------------------------------------------------------
def prepare_params(weight, bias, matmul_dtype=jnp.float32):
    """One-time prep of the Linear parameters.

    weight: (2L, C) torch nn.Linear layout; bias: (2L,).
    Returns the fused (C, 2L) weight (columns [0:L] = mu, [L:2L] = logvar) so the
    kernel does a single MXU pass, plus mu-only halves used in eval mode.
    matmul_dtype=jnp.bfloat16 is the fast path on v6e/v7x (keep f32 on v5e if
    exactness matters; accumulation/epilogue are f32 either way).
    """
    two_l, C = weight.shape
    L = two_l // 2
    w_fused = weight.T.astype(matmul_dtype)                  # (C, 2L)
    b_fused = bias.reshape(1, two_l).astype(jnp.float32)     # (1, 2L), f32
    return {
        "w": w_fused,
        "b": b_fused,
        "w_mu": w_fused[:, :L],
        "b_mu": b_fused[:, :L],
        "num_latents": int(L),
        "in_channels": int(C),
    }


# ---------------------------------------------------------------------------
# VMEM budget (per-generation safe: explicit limit, padded to (8,128) tiles)
# ---------------------------------------------------------------------------
def _ceil_to(v, m):
    return -(-v // m) * m


def _padded_bytes(rows, cols, itemsize):
    return _ceil_to(rows, 8) * _ceil_to(cols, 128) * itemsize


def _vmem_budget_bytes(tile_n, C, two_l, L, mm_itemsize, training):
    resident = _padded_bytes(C, two_l, mm_itemsize) + _padded_bytes(1, two_l, 4)
    streams = _padded_bytes(tile_n, C, mm_itemsize) + _padded_bytes(tile_n, L, 4)
    if training:
        streams += _padded_bytes(tile_n, L, 4)               # eps stream
    return resident + 2 * streams                             # double-buffered


# ---------------------------------------------------------------------------
# Forward wrapper
# ---------------------------------------------------------------------------
def unit_gaussian_prior_forward(x, params, eps=None, training=True, *, tile_n=512):
    """x: (N, C); params: from prepare_params(); eps: (N, L) standard normal."""
    N, C = x.shape
    L = params["num_latents"]
    two_l = 2 * L
    mm_dtype = params["w"].dtype
    mm_itemsize = jnp.dtype(mm_dtype).itemsize

    tile_n = min(tile_n, N)
    grid = (pl.cdiv(N, tile_n),)

    x_mm = x.astype(mm_dtype)
    out_shape = jax.ShapeDtypeStruct((N, L), x.dtype)

    est = _vmem_budget_bytes(tile_n, C, two_l, L, mm_itemsize, training)
    vmem_limit = min(max(4 * est, 16 << 20), 64 << 20)        # safe on v7x 64 MiB

    compiler_params = pltpu.CompilerParams(
        dimension_semantics=("parallel",),   # shard batch tiles across v7x's 2 TCs
        vmem_limit_bytes=vmem_limit,
    )

    x_spec = pl.BlockSpec((tile_n, C), lambda i: (i, 0))
    out_spec = pl.BlockSpec((tile_n, L), lambda i: (i, 0))

    if training:
        assert eps is not None, "training mode needs eps ~ N(0,1) of shape (N, L)"
        w_spec = pl.BlockSpec((C, two_l), lambda i: (0, 0))   # VMEM-resident
        b_spec = pl.BlockSpec((1, two_l), lambda i: (0, 0))   # VMEM-resident
        eps_spec = pl.BlockSpec((tile_n, L), lambda i: (i, 0))
        return pl.pallas_call(
            _train_kernel,
            out_shape=out_shape,
            grid=grid,
            in_specs=[x_spec, w_spec, b_spec, eps_spec],
            out_specs=out_spec,
            compiler_params=compiler_params,
        )(x_mm, params["w"], params["b"], eps.astype(jnp.float32))
    else:
        w_spec = pl.BlockSpec((C, L), lambda i: (0, 0))       # VMEM-resident
        b_spec = pl.BlockSpec((1, L), lambda i: (0, 0))       # VMEM-resident
        return pl.pallas_call(
            _eval_kernel,
            out_shape=out_shape,
            grid=grid,
            in_specs=[x_spec, w_spec, b_spec],
            out_specs=out_spec,
            compiler_params=compiler_params,
        )(x_mm, params["w_mu"], params["b_mu"])


# ---------------------------------------------------------------------------
# Demo / correctness check
# ---------------------------------------------------------------------------
if __name__ == "__main__":
    N, C, L = 8, 32, 16            # batch, in_channels, num_latents
    key = jax.random.PRNGKey(0)
    kx, kw, ke = jax.random.split(key, 3)

    # inputs
    x = jax.random.normal(kx, (N, C), dtype=jnp.float32)

    # deterministic parameter init (kaiming-normal weight; bias[num_latents:] = 1)
    weight = jax.random.normal(kw, (2 * L, C), dtype=jnp.float32) * jnp.sqrt(2.0 / C)
    bias = jnp.zeros((2 * L,), dtype=jnp.float32).at[L:].set(1.0)

    # reparameterization noise (training mode)
    eps = jax.random.normal(ke, (N, L), dtype=jnp.float32)

    # --- f32 MXU path (exact) ---
    params = prepare_params(weight, bias)
    out_train = jax.block_until_ready(
        unit_gaussian_prior_forward(x, params, eps=eps, training=True))
    out_eval = jax.block_until_ready(
        unit_gaussian_prior_forward(x, params, training=False))

    # --- bf16 MXU fast path (v6e/v7x), f32 accumulate + f32 epilogue ---
    params_bf16 = prepare_params(weight, bias, matmul_dtype=jnp.bfloat16)
    out_train_bf16 = jax.block_until_ready(
        unit_gaussian_prior_forward(x, params_bf16, eps=eps, training=True))

    # pure-JAX reference
    proj = x @ weight.T + bias
    mu_ref, logvar_ref = proj[:, :L], proj[:, L:]
    ref_train = mu_ref + jnp.exp(0.5 * logvar_ref) * eps
    ref_eval = mu_ref

    assert out_train.shape == (N, L) and out_eval.shape == (N, L)
    assert jnp.allclose(out_train, ref_train, atol=1e-5, rtol=1e-5)
    assert jnp.allclose(out_eval, ref_eval, atol=1e-5, rtol=1e-5)
    assert jnp.allclose(out_train_bf16, ref_train, atol=5e-2, rtol=5e-2)

    print("KERNEL_OK")
</pallas_src>

<mosaic_0001>
module attributes {stable_mosaic.version = 11 : i64} {
  func.func @_train_kernel(%arg0: i32, %arg1: memref<8x32xf32, #tpu.memory_space<vmem>>, %arg2: memref<32x32xf32, #tpu.memory_space<vmem>>, %arg3: memref<1x32xf32, #tpu.memory_space<vmem>>, %arg4: memref<8x16xf32, #tpu.memory_space<vmem>>, %arg5: memref<8x16xf32, #tpu.memory_space<vmem>>) attributes {dimension_semantics = [#tpu.dimension_semantics<parallel>], iteration_bounds = array<i64: 1>, scalar_prefetch = 0 : i64, scratch_operands = 0 : i64, tpu.core_type = #tpu.core_type<tc>, window_params = [{transform_indices = @transform_0, window_bounds = array<i64: 8, 32>}, {pipeline_mode = #tpu.pipeline_mode<synchronous>, transform_indices = @transform_1, window_bounds = array<i64: 32, 32>}, {pipeline_mode = #tpu.pipeline_mode<synchronous>, transform_indices = @transform_2, window_bounds = array<i64: 1, 32>}, {transform_indices = @transform_3, window_bounds = array<i64: 8, 16>}, {transform_indices = @transform_4, window_bounds = array<i64: 8, 16>}]} {
    %c0 = arith.constant 0 : index
    %c0_0 = arith.constant 0 : index
    %0 = vector.load %arg1[%c0, %c0_0] : memref<8x32xf32, #tpu.memory_space<vmem>>, vector<8x32xf32>
    %c0_1 = arith.constant 0 : index
    %c0_2 = arith.constant 0 : index
    %1 = vector.load %arg2[%c0_1, %c0_2] : memref<32x32xf32, #tpu.memory_space<vmem>>, vector<32x32xf32>
    %cst = arith.constant dense<0.000000e+00> : vector<8x32xf32>
    %2 = tpu.matmul %0, %1, %cst {dimension_numbers = #tpu.dot_dimension_numbers<[1], [0], [0], [1], [0, 0, 1, 1], [], []>} : vector<8x32xf32>, vector<32x32xf32>, vector<8x32xf32> -> vector<8x32xf32>
    %c0_3 = arith.constant 0 : index
    %c0_4 = arith.constant 0 : index
    %3 = vector.load %arg3[%c0_3, %c0_4] : memref<1x32xf32, #tpu.memory_space<vmem>>, vector<1x32xf32>
    %4 = vector.broadcast %3 : vector<1x32xf32> to vector<8x32xf32>
    %5 = arith.addf %2, %4 : vector<8x32xf32>
    %6 = vector.extract_strided_slice %5 {offsets = [0, 0], sizes = [8, 16], strides = [1, 1]} : vector<8x32xf32> to vector<8x16xf32>
    %7 = vector.extract_strided_slice %5 {offsets = [0, 16], sizes = [8, 16], strides = [1, 1]} : vector<8x32xf32> to vector<8x16xf32>
    %cst_5 = arith.constant 5.000000e-01 : f32
    %8 = vector.broadcast %cst_5 : f32 to vector<8x16xf32>
    %9 = arith.mulf %8, %7 : vector<8x16xf32>
    %10 = math.exp %9 : vector<8x16xf32>
    %c0_6 = arith.constant 0 : index
    %c0_7 = arith.constant 0 : index
    %11 = vector.load %arg4[%c0_6, %c0_7] : memref<8x16xf32, #tpu.memory_space<vmem>>, vector<8x16xf32>
    %12 = arith.mulf %10, %11 : vector<8x16xf32>
    %13 = arith.addf %6, %12 : vector<8x16xf32>
    %c0_8 = arith.constant 0 : index
    %c0_9 = arith.constant 0 : index
    %14 = vector.load %arg5[%c0_8, %c0_9] : memref<8x16xf32, #tpu.memory_space<vmem>>, vector<8x16xf32>
    tpu.vector_store %arg5[%c0_8, %c0_9], %13 {strides = array<i32>} : memref<8x16xf32, #tpu.memory_space<vmem>>, vector<8x16xf32>,
    return
  }
  func.func @transform_0(%arg0: i32) -> (i32, i32) {
    %c0_i32 = arith.constant 0 : i32
    %c0_i32_0 = arith.constant 0 : i32
    return %arg0, %c0_i32 : i32, i32
  }
  func.func @transform_1(%arg0: i32) -> (i32, i32) {
    %c0_i32 = arith.constant 0 : i32
    %c0_i32_0 = arith.constant 0 : i32
    %c0_i32_1 = arith.constant 0 : i32
    return %c0_i32, %c0_i32_0 : i32, i32
  }
  func.func @transform_2(%arg0: i32) -> (i32, i32) {
    %c0_i32 = arith.constant 0 : i32
    %c0_i32_0 = arith.constant 0 : i32
    %c0_i32_1 = arith.constant 0 : i32
    return %c0_i32, %c0_i32_0 : i32, i32
  }
  func.func @transform_3(%arg0: i32) -> (i32, i32) {
    %c0_i32 = arith.constant 0 : i32
    %c0_i32_0 = arith.constant 0 : i32
    return %arg0, %c0_i32 : i32, i32
  }
  func.func @transform_4(%arg0: i32) -> (i32, i32) {
    %c0_i32 = arith.constant 0 : i32
    %c0_i32_0 = arith.constant 0 : i32
    return %arg0, %c0_i32 : i32, i32
  }
}

</mosaic_0001>

<bundles_post_ra>
// kernel: tpu_custom_call.1
= control target key start
LH: loop header
LB: loop body
LE: loop exit
PB: predicated region body
PF: predicated region fallthrough
CT: control target
= control target key end

     0   :  { %9 = vsyncpa [#allocation3], 0  ;;  %s339_s0 = inlined_call_operand.hbm [shape: f32[8,32], index: 0, kind: input, shape index: {}]   ;;  %s340_s1 = inlined_call_operand.hbm [shape: f32[32,32], index: 1, kind: input, shape index: {}]   ;;  %s341_s2 = inlined_call_operand.vmem [shape: f32[1,32], index: 2, kind: input, shape index: {}]   ;;  %s342_s3 = inlined_call_operand.hbm [shape: f32[8,16], index: 3, kind: input, shape index: {}]   ;;  %s343_s4 = inlined_call_operand.hbm [shape: f32[8,16], index: 4, kind: output, shape index: {}]  }
   0x1   :  { %10 = vsyncpa [#allocation6], 0 }
   0x2   :  { %11 = vsyncpa [#allocation4], 0  ;;  %s289_s15 = smov [#allocation5]  }
   0x3   :  { %s27_s16 = sshll.u32 %s289_s15, 4  ;;  %s28_s16 = int_to_ptr.vmem [resolvable:$true] %s27_s16 }
   0x4   :  { %s211_s17 = scalar_lea.vmem %s28_s16, 512  ;;  %p216_p1 = scmp.lt.s32.totalorder %s28_s16, %s28_s16 }
   0x5   :  { %p212_p0 = scmp.ne.s32.totalorder %s28_s16, %s211_s17  ;;  %p217_p2 = scmp.lt.s32.totalorder %s211_s17, %s211_s17 }
   0x7   :  { %p218_p3 = por %p217_p2, %p216_p1 }
   0x9   :  { %p219_p4 = pnand %p218_p3, %p212_p0 }
   0xb   :  { %222 = shalt.err (!%p219_p4)
}
   0xc   :  { %s290_s18 = smov 128   ;;  %s291_s19 = smov 8  }
   0xd   :  { %33 = dma.hbm_to_vmem [thread:$0]  %s340_s1, 512, %s28_s16, [#allocation6], %s290_s18, %s290_s18, %s291_s19  }
   0xe   :  { %s292_s22 = smov [#allocation2]   ;;  %s293_s24 = smov [#allocation7]  }
   0xf   :  { %s18_s23 = sshll.u32 %s292_s22, 4  ;;  %s42_s25 = sshll.u32 %s293_s24, 4  ;;  %s19_s23 = int_to_ptr.vmem [resolvable:$true] %s18_s23  ;;  %s43_s25 = int_to_ptr.vmem [resolvable:$true] %s42_s25 }
  0x10   :  { %s231_s26 = scalar_lea.vmem %s19_s23, 128  ;;  %p236_p6 = scmp.lt.s32.totalorder %s19_s23, %s19_s23 }
  0x11   :  { %p232_p5 = scmp.ne.s32.totalorder %s19_s23, %s231_s26  ;;  %p237_p7 = scmp.lt.s32.totalorder %s231_s26, %s231_s26 }
  0x13   :  { %p238_p8 = por %p237_p7, %p236_p6 }
  0x15   :  { %p239_p9 = pnand %p238_p8, %p232_p5 }
  0x17   :  { %242 = shalt.err (!%p239_p9)
}
  0x18   :  { %21 = dma.hbm_to_vmem [thread:$0]  %s339_s0, 128, %s19_s23, [#allocation3]  }
  0x19   :  { %s251_s29 = scalar_lea.vmem %s43_s25, 128  ;;  %p256_p11 = scmp.lt.s32.totalorder %s43_s25, %s43_s25 }
  0x1a   :  { %p252_p10 = scmp.ne.s32.totalorder %s43_s25, %s251_s29  ;;  %p257_p12 = scmp.lt.s32.totalorder %s251_s29, %s251_s29 }
  0x1c   :  { %p258_p13 = por %p257_p12, %p256_p11 }
  0x1e   :  { %p259_p0 = pnand %p258_p13, %p252_p10 }
  0x20   :  { %262 = shalt.err (!%p259_p0)
}
  0x21   :  { %45 = dma.hbm_to_vmem [thread:$0]  %s342_s3, 128, %s43_s25, [#allocation6]  }
  0x22   :  { %283 = dma.done.wait [#allocation3], 128  }
  0x23   :  { %284 = vsyncadd [#allocation3], 4294967168 }
  0x24   :  { %285 = dma.done.wait [#allocation6], 640  }
  0x25   :  { %286 = vsyncadd [#allocation6], 4294966656  ;;  %v294_v0 = vmov 0.0   ;;  %vm295_vm0 = vmmov 0   ;;  %v59_v1 = vld [vmem:[#allocation5 + $0x18] sm:$0xff]  ;;  %v58_v2 = vld [vmem:[#allocation5 + $0x10] sm:$0xff] }
  0x26   :  { %180 = vmatprep.subr.mxu0 %v294_v0  ;;  %188 = vmatprep.mubr.msk.f32.mxu0 %vm295_vm0, %v294_v0  ;;  %v144_v3 = vld [vmem:[#allocation7] sm:$0xff]  ;;  %v57_v4 = vld [vmem:[#allocation5 + $0x8] sm:$0xff]  ;;  %s296_s0 = smov 16   ;;  %v55_v6 = vld [vmem:[#allocation2] sm:$0xff]  ;;  %vm67_vm1 = vcmask 261120   ;;  %s297_s6 = smov 112  }
  0x27   :  { %181 = vmatpush3.msra.mxu0 %v59_v1  ;;  %146 = vrot.lane.b32.xlu0 %v144_v3, %s296_s0  ;;  %v56_v5 = vld [vmem:[#allocation5] sm:$0xff]  ;;  %v173_v7 = vld [vmem:[%s341_s2] ss:$0 sm:$0xff]  ;;  %s298_s7 = smov [#allocation8]   ;;  %vm155_vm2 = vcmask 130048  }
  0x28   :  { %182 = vmatprep.subr.mxu0 %v294_v0  ;;  %s163_s8 = sshll.u32 %s298_s7, 4  ;;  %s164_s8 = int_to_ptr.vmem [resolvable:$true] %s163_s8 }
  0x29   :  { %183 = vmatpush3.msra.mxu0 %v58_v2  ;;  %s263_s9 = scalar_lea.vmem %s164_s8, 128  ;;  %p268_p2 = scmp.lt.s32.totalorder %s164_s8, %s164_s8 }
  0x2a   :  { %184 = vmatprep.subr.mxu0 %v294_v0  ;;  %p264_p1 = scmp.ne.s32.totalorder %s164_s8, %s263_s9  ;;  %p269_p3 = scmp.lt.s32.totalorder %s263_s9, %s263_s9 }
  0x2b   :  { %185 = vmatpush3.msra.mxu0 %v57_v4 }
  0x2c   :  { %186 = vmatprep.subr.mxu0 %v294_v0  ;;  %p270_p4 = por %p269_p3, %p268_p2 }
  0x2d   :  { %187 = vmatpush3.msra.mxu0 %v56_v5 }
  0x2e   :  { %189 = vmatmul.mubr.msk.f32.vlgmr.msra.gmra.mxu0 %vm67_vm1, %v55_v6  ;;  %p271_p5 = pnand %p270_p4, %p264_p1 }
  0x99   :  { %v147_v13 = vpop.permute.xlu0 %146 }
  0xee   :  { %v137_v8 = vpop.f32.mrf.mxu0 }
  0xef   :  { %v138_v9 = vadd.f32 %v173_v7, %v137_v8 }
  0xf0   :  { %v190_v10 = vpop.f32.mrf.mxu0 }
  0xf1   :  { %v141_v11 = vmul.f32 0.5, %v138_v9 }
  0xf3   :  { %v142_v12 = vmul.f32 1.442695, %v141_v11 }
  0xf5   :  { %201 = vpow2.f32 %v142_v12 }
 0x102   :  { %v202_v14 = vpop.eup %201 }
 0x103   :  { %v149_v15 = vmul.f32 %v202_v14, %v147_v13 }
 0x105   :  { %151 = vrot.lane.b32.xlu0 %v149_v15, %s297_s6 }
 0x177   :  { %v152_v16 = vpop.permute.xlu0 %151 }
 0x178   :  { %v154_v17 = vadd.f32 %v152_v16, %v138_v9 }
 0x17a   :  { %156 = vst.msk [vmem:[#allocation8] sm:$0xff] %vm155_vm2, %v154_v17 }
 0x17b   :  { %274 = shalt.err (!%p271_p5)
}
 0x17c   :  { %166 = dma.vmem_to_hbm [thread:$0]  %s164_s8, 128, %s343_s4, [#allocation4]  }
 0x17d   :  { %287 = dma.done.wait [#allocation4], 128  }
 0x17e   :  { %288 = vsyncadd [#allocation4], 4294967168 }
 0x17f   :  { %170 = vsyncpa [#allocation3], 1 }
 0x180   :  { %171 = vsyncpa [#allocation6], 1 }
 0x181   :  { %172 = vsyncpa [#allocation4], 1 }

</bundles_post_ra>
